<compile_context>
chip_gen: v5e
topology: v5e:2x2
jax: 0.10.0
libtpu: 0.0.40
codegen_flags: <defaults>
</compile_context>

<pallas_src>
from collections import namedtuple

import jax
import jax.numpy as jnp
from jax.experimental import pallas as pl
from jax.experimental.pallas import tpu as pltpu

LANE = 128
MIN_PALLAS_ELEMS = 1024            # below this, plain fused XLA elementwise
BLOCK_TARGET_ELEMS = 128 * 2048    # ~1 MiB per f32 block buffer


def _sgd_kernel(lr_ref, w_ref, g_ref, out_ref):
    # Elementwise VPU update on one lane-dense (tile_r, C) block.
    lr = lr_ref[0]
    out_ref[...] = (w_ref[...] - lr * g_ref[...]).astype(out_ref.dtype)


def _pallas_sgd_2d(w2, g2, lr_arr, tile_r):
    rows, cols = w2.shape
    return pl.pallas_call(
        _sgd_kernel,
        out_shape=jax.ShapeDtypeStruct(w2.shape, w2.dtype),
        grid=(pl.cdiv(rows, tile_r),),
        in_specs=[
            # learning rate: whole (1,) array lives in SMEM (no recompile per lr)
            pl.BlockSpec(memory_space=pltpu.MemorySpace.SMEM),
            pl.BlockSpec((tile_r, cols), lambda i: (i, 0)),
            pl.BlockSpec((tile_r, cols), lambda i: (i, 0)),
        ],
        out_specs=pl.BlockSpec((tile_r, cols), lambda i: (i, 0)),
        compiler_params=pltpu.CompilerParams(
            dimension_semantics=("parallel",),
        ),
    )(lr_arr, w2, g2)


def _pick_lane_width(n):
    """Largest multiple of 128 (capped at 2048) that divides n, else None."""
    for c in (2048, 1024, 512, 256, 128):
        if n % c == 0:
            return c
    return None


def _sgd_update_impl(w, g, lr_arr):
    """new_w = w - lr * g, out-of-place."""
    g = g.astype(w.dtype)
    if w.size < MIN_PALLAS_ELEMS:
        # Tiny params (biases etc.): a pallas_call is 100% launch overhead and
        # padded traffic — let XLA's fused elementwise handle it.
        return (w - lr_arr[0] * g).astype(w.dtype)

    flat_w = w.reshape(-1)
    flat_g = g.reshape(-1)
    n = flat_w.shape[0]

    cols = _pick_lane_width(n)
    padded = n
    if cols is None:
        # Rare fallback: flat size not a multiple of 128 — pad this tensor only.
        pad = (-n) % LANE
        flat_w = jnp.pad(flat_w, (0, pad))
        flat_g = jnp.pad(flat_g, (0, pad))
        padded = n + pad
        cols = _pick_lane_width(padded)

    rows = padded // cols
    # ~1 MiB (f32) per block buffer; tile_r is a multiple of 32 (bf16/int8 safe)
    # unless the whole array is smaller, in which case the block is full-extent.
    tile_r = min(rows, max(8, BLOCK_TARGET_ELEMS // cols))

    out2 = _pallas_sgd_2d(
        flat_w.reshape(rows, cols), flat_g.reshape(rows, cols), lr_arr, tile_r
    )

    out_flat = out2.reshape(-1)
    if padded != n:
        out_flat = out_flat[:n]
    return out_flat.reshape(w.shape)


# --- ingraph differentiability: custom VJP through the Pallas update ----------
@jax.custom_vjp
def sgd_update(w, g, lr_arr):
    return _sgd_update_impl(w, g, lr_arr)


def _sgd_update_fwd(w, g, lr_arr):
    return _sgd_update_impl(w, g, lr_arr), (g, lr_arr)


def _sgd_update_bwd(res, ct):
    g, lr_arr = res
    d_w = ct
    d_g = (-lr_arr[0] * ct).astype(g.dtype)
    d_lr = jnp.sum(-g.astype(jnp.float32) * ct.astype(jnp.float32))
    d_lr = d_lr.reshape(lr_arr.shape).astype(lr_arr.dtype)
    return d_w, d_g, d_lr


sgd_update.defvjp(_sgd_update_fwd, _sgd_update_bwd)


class IngraphGradientDescent:
    """JAX/Pallas equivalent of the PyTorch IngraphGradientDescent module."""

    OptimizerState = namedtuple("OptimizerState", [])

    def __init__(self, lr=0.1):
        self.learning_rate = lr

    def get_initial_state(self, params, **kwargs):
        return self.OptimizerState()

    def step(self, state, params, loss_fn, *loss_args):
        # Gradient of the scalar loss w.r.t. every parameter (autodiff = glue).
        grads = jax.grad(loss_fn)(params, *loss_args)
        lr_arr = jnp.asarray(self.learning_rate, dtype=jnp.float32).reshape(1)
        # TODO(synk): `detach=True` (stop-gradient copy) and the FixupResNet
        # [1,1]-parameter 0.1*lr special case are module-specific options of
        # get_updated_model and are not implemented here.
        updated = jax.tree_util.tree_map(
            lambda w, g: sgd_update(w, g, lr_arr), params, grads
        )
        return state, updated

    def __call__(self, *args, **kwargs):
        return self.step(*args, **kwargs)


if __name__ == "__main__":
    key = jax.random.PRNGKey(0)
    k_x, k_w, k_b, k_y = jax.random.split(key, 4)

    # Small synthetic "module": linear head on flattened NCHW input.
    B, C, H, W = 2, 4, 16, 16
    D_IN, D_OUT = C * H * W, 8

    x = jax.random.normal(k_x, (B, C, H, W), dtype=jnp.float32)
    y = jax.random.normal(k_y, (B, D_OUT), dtype=jnp.float32)

    params = {
        "W": jax.random.normal(k_w, (D_IN, D_OUT), dtype=jnp.float32) * 0.02,
        "b": jax.random.normal(k_b, (D_OUT,), dtype=jnp.float32) * 0.02,
    }

    def loss_fn(p, x, y):
        logits = x.reshape(B, -1) @ p["W"] + p["b"]
        return jnp.mean((logits - y) ** 2)

    opt = IngraphGradientDescent(lr=0.1)
    state = opt.get_initial_state(params)

    new_state, updated_params = opt(state, params, loss_fn, x, y)
    updated_params = jax.block_until_ready(updated_params)

    # Reference: pure-JAX one-step SGD.
    ref_grads = jax.grad(loss_fn)(params, x, y)
    ref_updated = jax.tree_util.tree_map(
        lambda w, g: w - opt.learning_rate * g, params, ref_grads
    )
    for name in params:
        assert jnp.allclose(
            updated_params[name], ref_updated[name], atol=1e-6, rtol=1e-6
        ), f"mismatch in {name}"

    # Ingraph check: gradients propagate THROUGH the Pallas update (custom VJP)
    # back to the original parameters, matching a pure-JAX update.
    def meta_loss(p, update_fn):
        g = jax.grad(loss_fn)(p, x, y)
        lr = jnp.asarray(0.1, jnp.float32).reshape(1)
        up = jax.tree_util.tree_map(lambda w_, g_: update_fn(w_, g_, lr), p, g)
        return jnp.sum(up["W"] * up["W"]) + jnp.sum(up["b"] * up["b"])

    mg_pallas = jax.grad(lambda p: meta_loss(p, sgd_update))(params)
    mg_ref = jax.grad(
        lambda p: meta_loss(p, lambda w_, g_, lr: w_ - lr[0] * g_)
    )(params)
    mg_pallas = jax.block_until_ready(mg_pallas)
    for name in params:
        assert jnp.allclose(
            mg_pallas[name], mg_ref[name], atol=1e-4, rtol=1e-3
        ), f"ingraph-grad mismatch in {name}"

    print("KERNEL_OK")
</pallas_src>

<mosaic_0001>
module attributes {stable_mosaic.version = 11 : i64} {
  func.func @_sgd_kernel(%arg0: i32, %arg1: memref<1xf32, #tpu.memory_space<smem>>, %arg2: memref<4x2048xf32, #tpu.memory_space<vmem>>, %arg3: memref<4x2048xf32, #tpu.memory_space<vmem>>, %arg4: memref<4x2048xf32, #tpu.memory_space<vmem>>) attributes {dimension_semantics = [#tpu.dimension_semantics<parallel>], iteration_bounds = array<i64: 1>, scalar_prefetch = 0 : i64, scratch_operands = 0 : i64, tpu.core_type = #tpu.core_type<tc>, window_params = [{transform_indices = @transform_0, window_bounds = array<i64: 1>}, {transform_indices = @transform_1, window_bounds = array<i64: 4, 2048>}, {transform_indices = @transform_2, window_bounds = array<i64: 4, 2048>}, {transform_indices = @transform_3, window_bounds = array<i64: 4, 2048>}]} {
    %c0 = arith.constant 0 : index
    %0 = memref.load %arg1[%c0] : memref<1xf32, #tpu.memory_space<smem>>
    %c0_0 = arith.constant 0 : index
    %c0_1 = arith.constant 0 : index
    %1 = vector.load %arg2[%c0_0, %c0_1] : memref<4x2048xf32, #tpu.memory_space<vmem>>, vector<4x2048xf32>
    %c0_2 = arith.constant 0 : index
    %c0_3 = arith.constant 0 : index
    %2 = vector.load %arg3[%c0_2, %c0_3] : memref<4x2048xf32, #tpu.memory_space<vmem>>, vector<4x2048xf32>
    %3 = vector.broadcast %0 : f32 to vector<4x2048xf32>
    %4 = arith.mulf %3, %2 : vector<4x2048xf32>
    %5 = arith.subf %1, %4 : vector<4x2048xf32>
    %c0_4 = arith.constant 0 : index
    %c0_5 = arith.constant 0 : index
    %6 = vector.load %arg4[%c0_4, %c0_5] : memref<4x2048xf32, #tpu.memory_space<vmem>>, vector<4x2048xf32>
    tpu.vector_store %arg4[%c0_4, %c0_5], %5 {strides = array<i32>} : memref<4x2048xf32, #tpu.memory_space<vmem>>, vector<4x2048xf32>,
    return
  }
  func.func @transform_0(%arg0: i32) -> i32 {
    %c0_i32 = arith.constant 0 : i32
    %c0_i32_0 = arith.constant 0 : i32
    return %c0_i32 : i32
  }
  func.func @transform_1(%arg0: i32) -> (i32, i32) {
    %c0_i32 = arith.constant 0 : i32
    %c0_i32_0 = arith.constant 0 : i32
    return %arg0, %c0_i32 : i32, i32
  }
  func.func @transform_2(%arg0: i32) -> (i32, i32) {
    %c0_i32 = arith.constant 0 : i32
    %c0_i32_0 = arith.constant 0 : i32
    return %arg0, %c0_i32 : i32, i32
  }
  func.func @transform_3(%arg0: i32) -> (i32, i32) {
    %c0_i32 = arith.constant 0 : i32
    %c0_i32_0 = arith.constant 0 : i32
    return %arg0, %c0_i32 : i32, i32
  }
}

</mosaic_0001>

<bundles_post_ra>
// kernel: tpu_custom_call.1
= control target key start
LH: loop header
LB: loop body
LE: loop exit
PB: predicated region body
PF: predicated region fallthrough
CT: control target
= control target key end

     0   :  { %9 = vsyncpa [#allocation4], 0  ;;  %s220_s0 = inlined_call_operand.<no memory space> [shape: f32[1], index: 0, kind: input, shape index: {}]   ;;  %s221_s1 = inlined_call_operand.hbm [shape: f32[4,2048], index: 1, kind: input, shape index: {}]   ;;  %s222_s2 = inlined_call_operand.hbm [shape: f32[4,2048], index: 2, kind: input, shape index: {}]   ;;  %s223_s3 = inlined_call_operand.hbm [shape: f32[4,2048], index: 3, kind: output, shape index: {}]  }
   0x1   :  { %10 = vsyncpa [#allocation7], 0 }
   0x2   :  { %11 = vsyncpa [#allocation5], 0  ;;  %s19_s14 = sshll.u32 %s221_s1, 4  ;;  %s185_s15 = smov [#allocation3]   ;;  %s20_s14 = int_to_ptr.hbm [resolvable:$true] %s19_s14 }
   0x3   :  { %s21_s16 = sshll.u32 %s185_s15, 4  ;;  %s30_s19 = sshll.u32 %s222_s2, 4  ;;  %s22_s16 = int_to_ptr.vmem [resolvable:$true] %s21_s16  ;;  %s31_s19 = int_to_ptr.hbm [resolvable:$true] %s30_s19 }
   0x4   :  { %24 = dma.hbm_to_vmem [thread:$0]  %s20_s14, 1024, %s22_s16, [#allocation4]  }
   0x5   :  { %s186_s20 = smov [#allocation6]  }
   0x6   :  { %s32_s21 = sshll.u32 %s186_s20, 4  ;;  %s33_s21 = int_to_ptr.vmem [resolvable:$true] %s32_s21 }
   0x7   :  { %35 = dma.hbm_to_vmem [thread:$0]  %s31_s19, 1024, %s33_s21, [#allocation7]  }
   0x8   :  { %179 = dma.done.wait [#allocation4], 1024  }
   0x9   :  { %180 = vsyncadd [#allocation4], 4294966272 }
   0xa   :  { %181 = dma.done.wait [#allocation7], 1024  }
   0xb   :  { %182 = vsyncadd [#allocation7], 4294966272  ;;  %v61_v0 = vstv %s220_s0  ;;  %v45_v1 = vld [vmem:[#allocation3] sm:$0xff]  ;;  %v46_v3 = vld [vmem:[#allocation3 + $0x8] sm:$0xff]  ;;  %s187_s0 = smov [#allocation8]   ;;  %s93_s25 = sshll.u32 %s223_s3, 4  ;;  %s94_s25 = int_to_ptr.hbm [resolvable:$true] %s93_s25 }
   0xc   :  { %v53_v2 = vld [vmem:[#allocation6] sm:$0xff]  ;;  %v54_v5 = vld [vmem:[#allocation6 + $0x8] sm:$0xff]  ;;  %v47_v6 = vld [vmem:[#allocation3 + $0x10] sm:$0xff]  ;;  %s91_s2 = sshll.u32 %s187_s0, 4  ;;  %s92_s2 = int_to_ptr.vmem [resolvable:$true] %s91_s2 }
   0xd   :  { %v62_v4 = vmul.f32 %v61_v0, %v53_v2  ;;  %v55_v7 = vld [vmem:[#allocation6 + $0x10] sm:$0xff]  ;;  %v63_v8 = vmul.f32 %v61_v0, %v54_v5  ;;  %v48_v10 = vld [vmem:[#allocation3 + $0x18] sm:$0xff]  ;;  %v49_v12 = vld [vmem:[#allocation3 + $0x20] sm:$0xff] }
   0xe   :  { %v64_v9 = vmul.f32 %v61_v0, %v55_v7  ;;  %v56_v11 = vld [vmem:[#allocation6 + $0x18] sm:$0xff]  ;;  %v57_v15 = vld [vmem:[#allocation6 + $0x20] sm:$0xff]  ;;  %v50_v16 = vld [vmem:[#allocation3 + $0x28] sm:$0xff] }
   0xf   :  { %v70_v13 = vsub.f32 %v45_v1, %v62_v4  ;;  %v65_v14 = vmul.f32 %v61_v0, %v56_v11  ;;  %v58_v17 = vld [vmem:[#allocation6 + $0x28] sm:$0xff]  ;;  %v71_v18 = vsub.f32 %v46_v3, %v63_v8  ;;  %v66_v20 = vmul.f32 %v61_v0, %v57_v15  ;;  %v51_v22 = vld [vmem:[#allocation3 + $0x30] sm:$0xff]  ;;  %v52_v26 = vld [vmem:[#allocation3 + $0x38] sm:$0xff] }
  0x10   :  { %v72_v19 = vsub.f32 %v47_v6, %v64_v9  ;;  %v67_v21 = vmul.f32 %v61_v0, %v58_v17  ;;  %v59_v23 = vld [vmem:[#allocation6 + $0x30] sm:$0xff]  ;;  %v60_v27 = vld [vmem:[#allocation6 + $0x38] sm:$0xff] }
  0x11   :  { %78 = vst [vmem:[#allocation8] sm:$0xff] %v70_v13  ;;  %v73_v24 = vsub.f32 %v48_v10, %v65_v14  ;;  %v68_v25 = vmul.f32 %v61_v0, %v59_v23  ;;  %v74_v28 = vsub.f32 %v49_v12, %v66_v20  ;;  %v69_v30 = vmul.f32 %v61_v0, %v60_v27 }
  0x12   :  { %79 = vst [vmem:[#allocation8 + $0x8] sm:$0xff] %v71_v18  ;;  %v75_v29 = vsub.f32 %v50_v16, %v67_v21 }
  0x13   :  { %80 = vst [vmem:[#allocation8 + $0x10] sm:$0xff] %v72_v19  ;;  %v76_v31 = vsub.f32 %v51_v22, %v68_v25  ;;  %v77_v32 = vsub.f32 %v52_v26, %v69_v30 }
  0x14   :  { %81 = vst [vmem:[#allocation8 + $0x18] sm:$0xff] %v73_v24 }
  0x15   :  { %82 = vst [vmem:[#allocation8 + $0x20] sm:$0xff] %v74_v28 }
  0x16   :  { %83 = vst [vmem:[#allocation8 + $0x28] sm:$0xff] %v75_v29 }
  0x17   :  { %84 = vst [vmem:[#allocation8 + $0x30] sm:$0xff] %v76_v31 }
  0x18   :  { %85 = vst [vmem:[#allocation8 + $0x38] sm:$0xff] %v77_v32 }
  0x19   :  { %96 = dma.vmem_to_hbm [thread:$0]  %s92_s2, 1024, %s94_s25, [#allocation5]  }
  0x1a   :  { %183 = dma.done.wait [#allocation5], 1024  }
  0x1b   :  { %184 = vsyncadd [#allocation5], 4294966272 }
  0x1c   :  { %101 = vsyncpa [#allocation4], 1 }
  0x1d   :  { %102 = vsyncpa [#allocation7], 1 }
  0x1e   :  { %103 = vsyncpa [#allocation5], 1 }

</bundles_post_ra>
